<compile_context>
chip_gen: v5e
topology: v5e:2x2
jax: 0.10.0
libtpu: 0.0.40
codegen_flags: <defaults>
</compile_context>

<pallas_src>
import functools

import jax
import jax.numpy as jnp
from jax import lax
from jax.experimental import pallas as pl
from jax.experimental.pallas import tpu as pltpu


# ---------------------------------------------------------------------------
# Fused tree-evaluation kernel: single invocation, in-kernel schedule walk.
# ---------------------------------------------------------------------------
def _tree_kernel(tok_ref, ls_ref, rs_ref, ds_ref,     # scalar prefetch (SMEM, int32)
                 emb_ref,                             # (input_vocab, V, L) in HBM (pl.ANY)
                 wl_ref, wr_ref,                      # (L, L) pre-transposed, VMEM-resident
                 o_ref,                               # (V, L) output
                 slots_ref, sem,                      # VMEM slot buffer + DMA semaphore
                 *, num_leaves, num_nodes, unroll):
    # ---- 1) Gather every leaf embedding row HBM -> its VMEM slot.
    #         Issue all DMAs first (overlapped), then drain.
    def _issue(j, c):
        pltpu.make_async_copy(emb_ref.at[tok_ref[j]], slots_ref.at[j], sem).start()
        return c

    lax.fori_loop(0, num_leaves, _issue, 0, unroll=unroll)

    def _drain(j, c):
        pltpu.make_async_copy(emb_ref.at[tok_ref[j]], slots_ref.at[j], sem).wait()
        return c

    lax.fori_loop(0, num_leaves, _drain, 0, unroll=unroll)

    # ---- 2) Post-order walk of the internal nodes inside ONE kernel invocation.
    #         a @ Wl^T + b @ Wr^T, accumulated in f32 on the MXU.
    def _combine(n):
        a = slots_ref[ls_ref[n]]                      # (V, L)
        b = slots_ref[rs_ref[n]]                      # (V, L)
        return (jnp.dot(a, wl_ref[...], preferred_element_type=jnp.float32)
                + jnp.dot(b, wr_ref[...], preferred_element_type=jnp.float32))

    def _body(n, c):
        slots_ref[ds_ref[n]] = _combine(n)
        return c

    lax.fori_loop(0, num_nodes - 1, _body, 0, unroll=unroll)

    # ---- 3) Root: write the output exactly once; skip the redundant slot store.
    o_ref[...] = _combine(num_nodes - 1).astype(o_ref.dtype)


# ---------------------------------------------------------------------------
# Host-side linearization of the static Python tuple-tree into a post-order
# node schedule with slot reuse (free-list).  Leaves occupy slots [0, n_leaves).
# ---------------------------------------------------------------------------
def _linearize(tree):
    leaf_tokens = []

    def collect(node):
        if isinstance(node, tuple):
            collect(node[0])
            collect(node[1])
        else:
            leaf_tokens.append(int(node))

    collect(tree)
    num_leaves = len(leaf_tokens)

    schedule = []              # (left_slot, right_slot, dest_slot), post-order
    free = []                  # freed slots available for reuse
    next_slot = [num_leaves]
    leaf_cursor = [0]

    def alloc():
        if free:
            return free.pop()
        s = next_slot[0]
        next_slot[0] += 1
        return s

    def visit(node):
        if isinstance(node, tuple):
            ls = visit(node[0])
            rs = visit(node[1])
            free.append(ls)
            free.append(rs)
            ds = alloc()       # dest may reuse a child slot: reads precede write
            schedule.append((ls, rs, ds))
            return ds
        s = leaf_cursor[0]
        leaf_cursor[0] += 1
        return s

    visit(tree)
    return leaf_tokens, schedule, next_slot[0]


def fused_tree_forward(tree, emb, wl_t, wr_t, output_vocab_size, output_len):
    """Evaluate the whole expression tree in one pallas_call."""
    V, L = output_vocab_size, output_len
    leaf_tokens, schedule, num_slots = _linearize(tree)
    num_leaves = len(leaf_tokens)
    num_nodes = len(schedule)

    toks = jnp.asarray(leaf_tokens, dtype=jnp.int32)
    ls = jnp.asarray([s[0] for s in schedule], dtype=jnp.int32)
    rs = jnp.asarray([s[1] for s in schedule], dtype=jnp.int32)
    ds = jnp.asarray([s[2] for s in schedule], dtype=jnp.int32)

    # (input_vocab, V*L) -> (input_vocab, V, L): free metadata reshape; rows are
    # DMA'd straight into their VMEM slots by the kernel (no host-side gather).
    emb3 = emb.reshape(emb.shape[0], V, L)

    unroll = bool(max(num_nodes, num_leaves) <= 32)
    kernel = functools.partial(_tree_kernel, num_leaves=num_leaves,
                               num_nodes=num_nodes, unroll=unroll)

    itemsize = jnp.dtype(jnp.float32).itemsize
    vmem_limit = (num_slots * V * L * itemsize      # activation slot buffer
                  + 2 * 2 * L * L * itemsize        # Wl^T / Wr^T (double-buffered)
                  + 2 * V * L * itemsize            # output block
                  + (8 << 20))                      # compiler headroom

    cost = pl.CostEstimate(
        flops=2 * num_nodes * V * L * (2 * L),
        transcendentals=0,
        bytes_accessed=itemsize * (num_leaves * V * L + 2 * L * L + V * L),
    )

    return pl.pallas_call(
        kernel,
        out_shape=jax.ShapeDtypeStruct((V, L), jnp.float32),
        grid_spec=pltpu.PrefetchScalarGridSpec(
            num_scalar_prefetch=4,
            grid=(1,),
            in_specs=[
                pl.BlockSpec(memory_space=pl.ANY),             # emb stays in HBM
                pl.BlockSpec((L, L), lambda i, *_: (0, 0)),    # Wl^T resident
                pl.BlockSpec((L, L), lambda i, *_: (0, 0)),    # Wr^T resident
            ],
            out_specs=pl.BlockSpec((V, L), lambda i, *_: (0, 0)),
            scratch_shapes=[
                pltpu.VMEM((num_slots, V, L), jnp.float32),    # activation slots
                pltpu.SemaphoreType.DMA,                       # leaf-gather DMA sem
            ],
        ),
        compiler_params=pltpu.CompilerParams(
            dimension_semantics=("arbitrary",),
            vmem_limit_bytes=int(vmem_limit),
        ),
        cost_estimate=cost,
    )(toks, ls, rs, ds, emb3, wl_t, wr_t)


# ---------------------------------------------------------------------------
# Composer module (functional JAX port of the PyTorch module)
# ---------------------------------------------------------------------------
class Composer:
    def __init__(self, input_vocab_size, output_vocab_size, output_len, key):
        self.input_vocab_size = input_vocab_size
        self.output_vocab_size = output_vocab_size
        self.output_len = output_len
        k_emb, k_l, k_r = jax.random.split(key, 3)
        # nn.Embedding(input_vocab_size, output_vocab_size * output_len)
        self.emb = jax.random.normal(
            k_emb, (input_vocab_size, output_vocab_size * output_len), jnp.float32
        )
        # nn.Linear(output_len, output_len, bias=False).weight -> (out, in)
        bound = 1.0 / (output_len ** 0.5)
        self.wl = jax.random.uniform(
            k_l, (output_len, output_len), jnp.float32, -bound, bound
        )
        self.wr = jax.random.uniform(
            k_r, (output_len, output_len), jnp.float32, -bound, bound
        )
        # Pre-transposed combine weights (MXU-ready, resident in VMEM in-kernel).
        self.wl_t = self.wl.T
        self.wr_t = self.wr.T

    def forward(self, x):
        if isinstance(x, tuple):
            return fused_tree_forward(
                x, self.emb, self.wl_t, self.wr_t,
                self.output_vocab_size, self.output_len,
            )
        # Single token: plain embedding lookup + reshape (no kernel needed).
        return self.emb[x].reshape(self.output_vocab_size, self.output_len)


# ---------------------------------------------------------------------------
# Pure-JAX reference for correctness check
# ---------------------------------------------------------------------------
def reference_forward(model: Composer, x):
    if isinstance(x, tuple):
        left = reference_forward(model, x[0])
        right = reference_forward(model, x[1])
        return left @ model.wl.T + right @ model.wr.T
    return model.emb[x].reshape(model.output_vocab_size, model.output_len)


if __name__ == "__main__":
    key = jax.random.PRNGKey(0)

    input_vocab_size = 12
    output_vocab_size = 8
    output_len = 128

    model = Composer(input_vocab_size, output_vocab_size, output_len, key)

    # A small static expression tree of token ids:  ((3, 7), (1, (5, 9)))
    tree = ((3, 7), (1, (5, 9)))

    out = model.forward(tree)
    out = jax.block_until_ready(out)

    ref = reference_forward(model, tree)
    assert out.shape == (output_vocab_size, output_len)
    assert jnp.allclose(out, ref, atol=1e-4, rtol=1e-4), "mismatch vs reference"

    print("KERNEL_OK")
</pallas_src>

<mosaic_0001>
module attributes {stable_mosaic.version = 11 : i64} {
  func.func @_tree_kernel(%arg0: i32, %arg1: memref<5xi32, #tpu.memory_space<smem>>, %arg2: memref<4xi32, #tpu.memory_space<smem>>, %arg3: memref<4xi32, #tpu.memory_space<smem>>, %arg4: memref<4xi32, #tpu.memory_space<smem>>, %arg5: memref<12x8x128xf32, #tpu.memory_space<any>>, %arg6: memref<128x128xf32, #tpu.memory_space<vmem>>, %arg7: memref<128x128xf32, #tpu.memory_space<vmem>>, %arg8: memref<8x128xf32, #tpu.memory_space<vmem>>, %arg9: memref<5x8x128xf32, #tpu.memory_space<vmem>>, %arg10: memref<!tpu.dma_semaphore, #tpu.memory_space<semaphore_mem>>) attributes {dimension_semantics = [#tpu.dimension_semantics<arbitrary>], iteration_bounds = array<i64: 1>, scalar_prefetch = 4 : i64, scratch_operands = 2 : i64, tpu.core_type = #tpu.core_type<tc>, window_params = [{}, {pipeline_mode = #tpu.pipeline_mode<synchronous>, transform_indices = @transform_1, window_bounds = array<i64: 128, 128>}, {pipeline_mode = #tpu.pipeline_mode<synchronous>, transform_indices = @transform_2, window_bounds = array<i64: 128, 128>}, {pipeline_mode = #tpu.pipeline_mode<synchronous>, transform_indices = @transform_3, window_bounds = array<i64: 8, 128>}]} {
    %c0_i32 = arith.constant 0 : i32
    %0 = arith.index_cast %c0_i32 : i32 to index
    %1 = memref.load %arg1[%0] : memref<5xi32, #tpu.memory_space<smem>>
    %c0_i32_0 = arith.constant 0 : i32
    %c0_i32_1 = arith.constant 0 : i32
    %2 = tpu.memref_slice %arg5[%1, %c0_i32_0, %c0_i32_1] : memref<12x8x128xf32, #tpu.memory_space<any>> -> memref<1x8x128xf32, #tpu.memory_space<any>>
    %3 = tpu.memref_squeeze %2 : memref<1x8x128xf32, #tpu.memory_space<any>> -> memref<8x128xf32, #tpu.memory_space<any>>
    %c0_i32_2 = arith.constant 0 : i32
    %c0_i32_3 = arith.constant 0 : i32
    %4 = tpu.memref_slice %arg9[%c0_i32, %c0_i32_2, %c0_i32_3] : memref<5x8x128xf32, #tpu.memory_space<vmem>> -> memref<1x8x128xf32, #tpu.memory_space<vmem>>
    %5 = tpu.memref_squeeze %4 : memref<1x8x128xf32, #tpu.memory_space<vmem>> -> memref<8x128xf32, #tpu.memory_space<vmem>>
    tpu.enqueue_dma source(%3 : memref<8x128xf32, #tpu.memory_space<any>>) target(%5 : memref<8x128xf32, #tpu.memory_space<vmem>>) target_semaphore(%arg10 : memref<!tpu.dma_semaphore, #tpu.memory_space<semaphore_mem>>)
    %c1_i32 = arith.constant 1 : i32
    %6 = arith.index_cast %c1_i32 : i32 to index
    %7 = memref.load %arg1[%6] : memref<5xi32, #tpu.memory_space<smem>>
    %c0_i32_4 = arith.constant 0 : i32
    %c0_i32_5 = arith.constant 0 : i32
    %8 = tpu.memref_slice %arg5[%7, %c0_i32_4, %c0_i32_5] : memref<12x8x128xf32, #tpu.memory_space<any>> -> memref<1x8x128xf32, #tpu.memory_space<any>>
    %9 = tpu.memref_squeeze %8 : memref<1x8x128xf32, #tpu.memory_space<any>> -> memref<8x128xf32, #tpu.memory_space<any>>
    %c0_i32_6 = arith.constant 0 : i32
    %c0_i32_7 = arith.constant 0 : i32
    %10 = tpu.memref_slice %arg9[%c1_i32, %c0_i32_6, %c0_i32_7] : memref<5x8x128xf32, #tpu.memory_space<vmem>> -> memref<1x8x128xf32, #tpu.memory_space<vmem>>
    %11 = tpu.memref_squeeze %10 : memref<1x8x128xf32, #tpu.memory_space<vmem>> -> memref<8x128xf32, #tpu.memory_space<vmem>>
    tpu.enqueue_dma source(%9 : memref<8x128xf32, #tpu.memory_space<any>>) target(%11 : memref<8x128xf32, #tpu.memory_space<vmem>>) target_semaphore(%arg10 : memref<!tpu.dma_semaphore, #tpu.memory_space<semaphore_mem>>)
    %c2_i32 = arith.constant 2 : i32
    %12 = arith.index_cast %c2_i32 : i32 to index
    %13 = memref.load %arg1[%12] : memref<5xi32, #tpu.memory_space<smem>>
    %c0_i32_8 = arith.constant 0 : i32
    %c0_i32_9 = arith.constant 0 : i32
    %14 = tpu.memref_slice %arg5[%13, %c0_i32_8, %c0_i32_9] : memref<12x8x128xf32, #tpu.memory_space<any>> -> memref<1x8x128xf32, #tpu.memory_space<any>>
    %15 = tpu.memref_squeeze %14 : memref<1x8x128xf32, #tpu.memory_space<any>> -> memref<8x128xf32, #tpu.memory_space<any>>
    %c0_i32_10 = arith.constant 0 : i32
    %c0_i32_11 = arith.constant 0 : i32
    %16 = tpu.memref_slice %arg9[%c2_i32, %c0_i32_10, %c0_i32_11] : memref<5x8x128xf32, #tpu.memory_space<vmem>> -> memref<1x8x128xf32, #tpu.memory_space<vmem>>
    %17 = tpu.memref_squeeze %16 : memref<1x8x128xf32, #tpu.memory_space<vmem>> -> memref<8x128xf32, #tpu.memory_space<vmem>>
    tpu.enqueue_dma source(%15 : memref<8x128xf32, #tpu.memory_space<any>>) target(%17 : memref<8x128xf32, #tpu.memory_space<vmem>>) target_semaphore(%arg10 : memref<!tpu.dma_semaphore, #tpu.memory_space<semaphore_mem>>)
    %c3_i32 = arith.constant 3 : i32
    %18 = arith.index_cast %c3_i32 : i32 to index
    %19 = memref.load %arg1[%18] : memref<5xi32, #tpu.memory_space<smem>>
    %c0_i32_12 = arith.constant 0 : i32
    %c0_i32_13 = arith.constant 0 : i32
    %20 = tpu.memref_slice %arg5[%19, %c0_i32_12, %c0_i32_13] : memref<12x8x128xf32, #tpu.memory_space<any>> -> memref<1x8x128xf32, #tpu.memory_space<any>>
    %21 = tpu.memref_squeeze %20 : memref<1x8x128xf32, #tpu.memory_space<any>> -> memref<8x128xf32, #tpu.memory_space<any>>
    %c0_i32_14 = arith.constant 0 : i32
    %c0_i32_15 = arith.constant 0 : i32
    %22 = tpu.memref_slice %arg9[%c3_i32, %c0_i32_14, %c0_i32_15] : memref<5x8x128xf32, #tpu.memory_space<vmem>> -> memref<1x8x128xf32, #tpu.memory_space<vmem>>
    %23 = tpu.memref_squeeze %22 : memref<1x8x128xf32, #tpu.memory_space<vmem>> -> memref<8x128xf32, #tpu.memory_space<vmem>>
    tpu.enqueue_dma source(%21 : memref<8x128xf32, #tpu.memory_space<any>>) target(%23 : memref<8x128xf32, #tpu.memory_space<vmem>>) target_semaphore(%arg10 : memref<!tpu.dma_semaphore, #tpu.memory_space<semaphore_mem>>)
    %c4_i32 = arith.constant 4 : i32
    %24 = arith.index_cast %c4_i32 : i32 to index
    %25 = memref.load %arg1[%24] : memref<5xi32, #tpu.memory_space<smem>>
    %c0_i32_16 = arith.constant 0 : i32
    %c0_i32_17 = arith.constant 0 : i32
    %26 = tpu.memref_slice %arg5[%25, %c0_i32_16, %c0_i32_17] : memref<12x8x128xf32, #tpu.memory_space<any>> -> memref<1x8x128xf32, #tpu.memory_space<any>>
    %27 = tpu.memref_squeeze %26 : memref<1x8x128xf32, #tpu.memory_space<any>> -> memref<8x128xf32, #tpu.memory_space<any>>
    %c0_i32_18 = arith.constant 0 : i32
    %c0_i32_19 = arith.constant 0 : i32
    %28 = tpu.memref_slice %arg9[%c4_i32, %c0_i32_18, %c0_i32_19] : memref<5x8x128xf32, #tpu.memory_space<vmem>> -> memref<1x8x128xf32, #tpu.memory_space<vmem>>
    %29 = tpu.memref_squeeze %28 : memref<1x8x128xf32, #tpu.memory_space<vmem>> -> memref<8x128xf32, #tpu.memory_space<vmem>>
    tpu.enqueue_dma source(%27 : memref<8x128xf32, #tpu.memory_space<any>>) target(%29 : memref<8x128xf32, #tpu.memory_space<vmem>>) target_semaphore(%arg10 : memref<!tpu.dma_semaphore, #tpu.memory_space<semaphore_mem>>)
    %c5_i32 = arith.constant 5 : i32
    %c0_i32_20 = arith.constant 0 : i32
    %30 = arith.index_cast %c0_i32_20 : i32 to index
    %31 = memref.load %arg1[%30] : memref<5xi32, #tpu.memory_space<smem>>
    %c0_i32_21 = arith.constant 0 : i32
    %c0_i32_22 = arith.constant 0 : i32
    %32 = tpu.memref_slice %arg5[%31, %c0_i32_21, %c0_i32_22] : memref<12x8x128xf32, #tpu.memory_space<any>> -> memref<1x8x128xf32, #tpu.memory_space<any>>
    %33 = tpu.memref_squeeze %32 : memref<1x8x128xf32, #tpu.memory_space<any>> -> memref<8x128xf32, #tpu.memory_space<any>>
    %c0_i32_23 = arith.constant 0 : i32
    %c0_i32_24 = arith.constant 0 : i32
    %34 = tpu.memref_slice %arg9[%c0_i32_20, %c0_i32_23, %c0_i32_24] : memref<5x8x128xf32, #tpu.memory_space<vmem>> -> memref<1x8x128xf32, #tpu.memory_space<vmem>>
    %35 = tpu.memref_squeeze %34 : memref<1x8x128xf32, #tpu.memory_space<vmem>> -> memref<8x128xf32, #tpu.memory_space<vmem>>
    tpu.wait_dma2 semaphore(%arg10 : memref<!tpu.dma_semaphore, #tpu.memory_space<semaphore_mem>>) src(%33 : memref<8x128xf32, #tpu.memory_space<any>>) dst(%35 : memref<8x128xf32, #tpu.memory_space<vmem>>)
    %c1_i32_25 = arith.constant 1 : i32
    %36 = arith.index_cast %c1_i32_25 : i32 to index
    %37 = memref.load %arg1[%36] : memref<5xi32, #tpu.memory_space<smem>>
    %c0_i32_26 = arith.constant 0 : i32
    %c0_i32_27 = arith.constant 0 : i32
    %38 = tpu.memref_slice %arg5[%37, %c0_i32_26, %c0_i32_27] : memref<12x8x128xf32, #tpu.memory_space<any>> -> memref<1x8x128xf32, #tpu.memory_space<any>>
    %39 = tpu.memref_squeeze %38 : memref<1x8x128xf32, #tpu.memory_space<any>> -> memref<8x128xf32, #tpu.memory_space<any>>
    %c0_i32_28 = arith.constant 0 : i32
    %c0_i32_29 = arith.constant 0 : i32
    %40 = tpu.memref_slice %arg9[%c1_i32_25, %c0_i32_28, %c0_i32_29] : memref<5x8x128xf32, #tpu.memory_space<vmem>> -> memref<1x8x128xf32, #tpu.memory_space<vmem>>
    %41 = tpu.memref_squeeze %40 : memref<1x8x128xf32, #tpu.memory_space<vmem>> -> memref<8x128xf32, #tpu.memory_space<vmem>>
    tpu.wait_dma2 semaphore(%arg10 : memref<!tpu.dma_semaphore, #tpu.memory_space<semaphore_mem>>) src(%39 : memref<8x128xf32, #tpu.memory_space<any>>) dst(%41 : memref<8x128xf32, #tpu.memory_space<vmem>>)
    %c2_i32_30 = arith.constant 2 : i32
    %42 = arith.index_cast %c2_i32_30 : i32 to index
    %43 = memref.load %arg1[%42] : memref<5xi32, #tpu.memory_space<smem>>
    %c0_i32_31 = arith.constant 0 : i32
    %c0_i32_32 = arith.constant 0 : i32
    %44 = tpu.memref_slice %arg5[%43, %c0_i32_31, %c0_i32_32] : memref<12x8x128xf32, #tpu.memory_space<any>> -> memref<1x8x128xf32, #tpu.memory_space<any>>
    %45 = tpu.memref_squeeze %44 : memref<1x8x128xf32, #tpu.memory_space<any>> -> memref<8x128xf32, #tpu.memory_space<any>>
    %c0_i32_33 = arith.constant 0 : i32
    %c0_i32_34 = arith.constant 0 : i32
    %46 = tpu.memref_slice %arg9[%c2_i32_30, %c0_i32_33, %c0_i32_34] : memref<5x8x128xf32, #tpu.memory_space<vmem>> -> memref<1x8x128xf32, #tpu.memory_space<vmem>>
    %47 = tpu.memref_squeeze %46 : memref<1x8x128xf32, #tpu.memory_space<vmem>> -> memref<8x128xf32, #tpu.memory_space<vmem>>
    tpu.wait_dma2 semaphore(%arg10 : memref<!tpu.dma_semaphore, #tpu.memory_space<semaphore_mem>>) src(%45 : memref<8x128xf32, #tpu.memory_space<any>>) dst(%47 : memref<8x128xf32, #tpu.memory_space<vmem>>)
    %c3_i32_35 = arith.constant 3 : i32
    %48 = arith.index_cast %c3_i32_35 : i32 to index
    %49 = memref.load %arg1[%48] : memref<5xi32, #tpu.memory_space<smem>>
    %c0_i32_36 = arith.constant 0 : i32
    %c0_i32_37 = arith.constant 0 : i32
    %50 = tpu.memref_slice %arg5[%49, %c0_i32_36, %c0_i32_37] : memref<12x8x128xf32, #tpu.memory_space<any>> -> memref<1x8x128xf32, #tpu.memory_space<any>>
    %51 = tpu.memref_squeeze %50 : memref<1x8x128xf32, #tpu.memory_space<any>> -> memref<8x128xf32, #tpu.memory_space<any>>
    %c0_i32_38 = arith.constant 0 : i32
    %c0_i32_39 = arith.constant 0 : i32
    %52 = tpu.memref_slice %arg9[%c3_i32_35, %c0_i32_38, %c0_i32_39] : memref<5x8x128xf32, #tpu.memory_space<vmem>> -> memref<1x8x128xf32, #tpu.memory_space<vmem>>
    %53 = tpu.memref_squeeze %52 : memref<1x8x128xf32, #tpu.memory_space<vmem>> -> memref<8x128xf32, #tpu.memory_space<vmem>>
    tpu.wait_dma2 semaphore(%arg10 : memref<!tpu.dma_semaphore, #tpu.memory_space<semaphore_mem>>) src(%51 : memref<8x128xf32, #tpu.memory_space<any>>) dst(%53 : memref<8x128xf32, #tpu.memory_space<vmem>>)
    %c4_i32_40 = arith.constant 4 : i32
    %54 = arith.index_cast %c4_i32_40 : i32 to index
    %55 = memref.load %arg1[%54] : memref<5xi32, #tpu.memory_space<smem>>
    %c0_i32_41 = arith.constant 0 : i32
    %c0_i32_42 = arith.constant 0 : i32
    %56 = tpu.memref_slice %arg5[%55, %c0_i32_41, %c0_i32_42] : memref<12x8x128xf32, #tpu.memory_space<any>> -> memref<1x8x128xf32, #tpu.memory_space<any>>
    %57 = tpu.memref_squeeze %56 : memref<1x8x128xf32, #tpu.memory_space<any>> -> memref<8x128xf32, #tpu.memory_space<any>>
    %c0_i32_43 = arith.constant 0 : i32
    %c0_i32_44 = arith.constant 0 : i32
    %58 = tpu.memref_slice %arg9[%c4_i32_40, %c0_i32_43, %c0_i32_44] : memref<5x8x128xf32, #tpu.memory_space<vmem>> -> memref<1x8x128xf32, #tpu.memory_space<vmem>>
    %59 = tpu.memref_squeeze %58 : memref<1x8x128xf32, #tpu.memory_space<vmem>> -> memref<8x128xf32, #tpu.memory_space<vmem>>
    tpu.wait_dma2 semaphore(%arg10 : memref<!tpu.dma_semaphore, #tpu.memory_space<semaphore_mem>>) src(%57 : memref<8x128xf32, #tpu.memory_space<any>>) dst(%59 : memref<8x128xf32, #tpu.memory_space<vmem>>)
    %c5_i32_45 = arith.constant 5 : i32
    %c0_i32_46 = arith.constant 0 : i32
    %60 = arith.index_cast %c0_i32_46 : i32 to index
    %61 = memref.load %arg2[%60] : memref<4xi32, #tpu.memory_space<smem>>
    %62 = arith.index_cast %61 : i32 to index
    %c0 = arith.constant 0 : index
    %c0_47 = arith.constant 0 : index
    %63 = vector.load %arg9[%62, %c0, %c0_47] : memref<5x8x128xf32, #tpu.memory_space<vmem>>, vector<1x8x128xf32>
    %64 = vector.shape_cast %63 : vector<1x8x128xf32> to vector<8x128xf32>
    %65 = arith.index_cast %c0_i32_46 : i32 to index
    %66 = memref.load %arg3[%65] : memref<4xi32, #tpu.memory_space<smem>>
    %67 = arith.index_cast %66 : i32 to index
    %c0_48 = arith.constant 0 : index
    %c0_49 = arith.constant 0 : index
    %68 = vector.load %arg9[%67, %c0_48, %c0_49] : memref<5x8x128xf32, #tpu.memory_space<vmem>>, vector<1x8x128xf32>
    %69 = vector.shape_cast %68 : vector<1x8x128xf32> to vector<8x128xf32>
    %c0_50 = arith.constant 0 : index
    %c0_51 = arith.constant 0 : index
    %70 = vector.load %arg6[%c0_50, %c0_51] : memref<128x128xf32, #tpu.memory_space<vmem>>, vector<128x128xf32>
    %cst = arith.constant dense<0.000000e+00> : vector<8x128xf32>
    %71 = tpu.matmul %64, %70, %cst {dimension_numbers = #tpu.dot_dimension_numbers<[1], [0], [0], [1], [0, 0, 1, 1], [], []>} : vector<8x128xf32>, vector<128x128xf32>, vector<8x128xf32> -> vector<8x128xf32>
    %c0_52 = arith.constant 0 : index
    %c0_53 = arith.constant 0 : index
    %72 = vector.load %arg7[%c0_52, %c0_53] : memref<128x128xf32, #tpu.memory_space<vmem>>, vector<128x128xf32>
    %cst_54 = arith.constant dense<0.000000e+00> : vector<8x128xf32>
    %73 = tpu.matmul %69, %72, %cst_54 {dimension_numbers = #tpu.dot_dimension_numbers<[1], [0], [0], [1], [0, 0, 1, 1], [], []>} : vector<8x128xf32>, vector<128x128xf32>, vector<8x128xf32> -> vector<8x128xf32>
    %74 = arith.addf %71, %73 : vector<8x128xf32>
    %75 = arith.index_cast %c0_i32_46 : i32 to index
    %76 = memref.load %arg4[%75] : memref<4xi32, #tpu.memory_space<smem>>
    %77 = arith.index_cast %76 : i32 to index
    %c0_55 = arith.constant 0 : index
    %c0_56 = arith.constant 0 : index
    %78 = vector.load %arg9[%77, %c0_55, %c0_56] : memref<5x8x128xf32, #tpu.memory_space<vmem>>, vector<1x8x128xf32>
    %79 = vector.shape_cast %78 : vector<1x8x128xf32> to vector<8x128xf32>
    %80 = vector.shape_cast %74 : vector<8x128xf32> to vector<1x8x128xf32>
    tpu.vector_store %arg9[%77, %c0_55, %c0_56], %80 {strides = array<i32>} : memref<5x8x128xf32, #tpu.memory_space<vmem>>, vector<1x8x128xf32>,
    %c1_i32_57 = arith.constant 1 : i32
    %81 = arith.index_cast %c1_i32_57 : i32 to index
    %82 = memref.load %arg2[%81] : memref<4xi32, #tpu.memory_space<smem>>
    %83 = arith.index_cast %82 : i32 to index
    %c0_58 = arith.constant 0 : index
    %c0_59 = arith.constant 0 : index
    %84 = vector.load %arg9[%83, %c0_58, %c0_59] : memref<5x8x128xf32, #tpu.memory_space<vmem>>, vector<1x8x128xf32>
    %85 = vector.shape_cast %84 : vector<1x8x128xf32> to vector<8x128xf32>
    %86 = arith.index_cast %c1_i32_57 : i32 to index
    %87 = memref.load %arg3[%86] : memref<4xi32, #tpu.memory_space<smem>>
    %88 = arith.index_cast %87 : i32 to index
    %c0_60 = arith.constant 0 : index
    %c0_61 = arith.constant 0 : index
    %89 = vector.load %arg9[%88, %c0_60, %c0_61] : memref<5x8x128xf32, #tpu.memory_space<vmem>>, vector<1x8x128xf32>
    %90 = vector.shape_cast %89 : vector<1x8x128xf32> to vector<8x128xf32>
    %c0_62 = arith.constant 0 : index
    %c0_63 = arith.constant 0 : index
    %91 = vector.load %arg6[%c0_62, %c0_63] : memref<128x128xf32, #tpu.memory_space<vmem>>, vector<128x128xf32>
    %cst_64 = arith.constant dense<0.000000e+00> : vector<8x128xf32>
    %92 = tpu.matmul %85, %91, %cst_64 {dimension_numbers = #tpu.dot_dimension_numbers<[1], [0], [0], [1], [0, 0, 1, 1], [], []>} : vector<8x128xf32>, vector<128x128xf32>, vector<8x128xf32> -> vector<8x128xf32>
    %c0_65 = arith.constant 0 : index
    %c0_66 = arith.constant 0 : index
    %93 = vector.load %arg7[%c0_65, %c0_66] : memref<128x128xf32, #tpu.memory_space<vmem>>, vector<128x128xf32>
    %cst_67 = arith.constant dense<0.000000e+00> : vector<8x128xf32>
    %94 = tpu.matmul %90, %93, %cst_67 {dimension_numbers = #tpu.dot_dimension_numbers<[1], [0], [0], [1], [0, 0, 1, 1], [], []>} : vector<8x128xf32>, vector<128x128xf32>, vector<8x128xf32> -> vector<8x128xf32>
    %95 = arith.addf %92, %94 : vector<8x128xf32>
    %96 = arith.index_cast %c1_i32_57 : i32 to index
    %97 = memref.load %arg4[%96] : memref<4xi32, #tpu.memory_space<smem>>
    %98 = arith.index_cast %97 : i32 to index
    %c0_68 = arith.constant 0 : index
    %c0_69 = arith.constant 0 : index
    %99 = vector.load %arg9[%98, %c0_68, %c0_69] : memref<5x8x128xf32, #tpu.memory_space<vmem>>, vector<1x8x128xf32>
    %100 = vector.shape_cast %99 : vector<1x8x128xf32> to vector<8x128xf32>
    %101 = vector.shape_cast %95 : vector<8x128xf32> to vector<1x8x128xf32>
    tpu.vector_store %arg9[%98, %c0_68, %c0_69], %101 {strides = array<i32>} : memref<5x8x128xf32, #tpu.memory_space<vmem>>, vector<1x8x128xf32>,
    %c2_i32_70 = arith.constant 2 : i32
    %102 = arith.index_cast %c2_i32_70 : i32 to index
    %103 = memref.load %arg2[%102] : memref<4xi32, #tpu.memory_space<smem>>
    %104 = arith.index_cast %103 : i32 to index
    %c0_71 = arith.constant 0 : index
    %c0_72 = arith.constant 0 : index
    %105 = vector.load %arg9[%104, %c0_71, %c0_72] : memref<5x8x128xf32, #tpu.memory_space<vmem>>, vector<1x8x128xf32>
    %106 = vector.shape_cast %105 : vector<1x8x128xf32> to vector<8x128xf32>
    %107 = arith.index_cast %c2_i32_70 : i32 to index
    %108 = memref.load %arg3[%107] : memref<4xi32, #tpu.memory_space<smem>>
    %109 = arith.index_cast %108 : i32 to index
    %c0_73 = arith.constant 0 : index
    %c0_74 = arith.constant 0 : index
    %110 = vector.load %arg9[%109, %c0_73, %c0_74] : memref<5x8x128xf32, #tpu.memory_space<vmem>>, vector<1x8x128xf32>
    %111 = vector.shape_cast %110 : vector<1x8x128xf32> to vector<8x128xf32>
    %c0_75 = arith.constant 0 : index
    %c0_76 = arith.constant 0 : index
    %112 = vector.load %arg6[%c0_75, %c0_76] : memref<128x128xf32, #tpu.memory_space<vmem>>, vector<128x128xf32>
    %cst_77 = arith.constant dense<0.000000e+00> : vector<8x128xf32>
    %113 = tpu.matmul %106, %112, %cst_77 {dimension_numbers = #tpu.dot_dimension_numbers<[1], [0], [0], [1], [0, 0, 1, 1], [], []>} : vector<8x128xf32>, vector<128x128xf32>, vector<8x128xf32> -> vector<8x128xf32>
    %c0_78 = arith.constant 0 : index
    %c0_79 = arith.constant 0 : index
    %114 = vector.load %arg7[%c0_78, %c0_79] : memref<128x128xf32, #tpu.memory_space<vmem>>, vector<128x128xf32>
    %cst_80 = arith.constant dense<0.000000e+00> : vector<8x128xf32>
    %115 = tpu.matmul %111, %114, %cst_80 {dimension_numbers = #tpu.dot_dimension_numbers<[1], [0], [0], [1], [0, 0, 1, 1], [], []>} : vector<8x128xf32>, vector<128x128xf32>, vector<8x128xf32> -> vector<8x128xf32>
    %116 = arith.addf %113, %115 : vector<8x128xf32>
    %117 = arith.index_cast %c2_i32_70 : i32 to index
    %118 = memref.load %arg4[%117] : memref<4xi32, #tpu.memory_space<smem>>
    %119 = arith.index_cast %118 : i32 to index
    %c0_81 = arith.constant 0 : index
    %c0_82 = arith.constant 0 : index
    %120 = vector.load %arg9[%119, %c0_81, %c0_82] : memref<5x8x128xf32, #tpu.memory_space<vmem>>, vector<1x8x128xf32>
    %121 = vector.shape_cast %120 : vector<1x8x128xf32> to vector<8x128xf32>
    %122 = vector.shape_cast %116 : vector<8x128xf32> to vector<1x8x128xf32>
    tpu.vector_store %arg9[%119, %c0_81, %c0_82], %122 {strides = array<i32>} : memref<5x8x128xf32, #tpu.memory_space<vmem>>, vector<1x8x128xf32>,
    %c3_i32_83 = arith.constant 3 : i32
    %c3 = arith.constant 3 : index
    %123 = memref.load %arg2[%c3] : memref<4xi32, #tpu.memory_space<smem>>
    %124 = arith.index_cast %123 : i32 to index
    %c0_84 = arith.constant 0 : index
    %c0_85 = arith.constant 0 : index
    %125 = vector.load %arg9[%124, %c0_84, %c0_85] : memref<5x8x128xf32, #tpu.memory_space<vmem>>, vector<1x8x128xf32>
    %126 = vector.shape_cast %125 : vector<1x8x128xf32> to vector<8x128xf32>
    %c3_86 = arith.constant 3 : index
    %127 = memref.load %arg3[%c3_86] : memref<4xi32, #tpu.memory_space<smem>>
    %128 = arith.index_cast %127 : i32 to index
    %c0_87 = arith.constant 0 : index
    %c0_88 = arith.constant 0 : index
    %129 = vector.load %arg9[%128, %c0_87, %c0_88] : memref<5x8x128xf32, #tpu.memory_space<vmem>>, vector<1x8x128xf32>
    %130 = vector.shape_cast %129 : vector<1x8x128xf32> to vector<8x128xf32>
    %c0_89 = arith.constant 0 : index
    %c0_90 = arith.constant 0 : index
    %131 = vector.load %arg6[%c0_89, %c0_90] : memref<128x128xf32, #tpu.memory_space<vmem>>, vector<128x128xf32>
    %cst_91 = arith.constant dense<0.000000e+00> : vector<8x128xf32>
    %132 = tpu.matmul %126, %131, %cst_91 {dimension_numbers = #tpu.dot_dimension_numbers<[1], [0], [0], [1], [0, 0, 1, 1], [], []>} : vector<8x128xf32>, vector<128x128xf32>, vector<8x128xf32> -> vector<8x128xf32>
    %c0_92 = arith.constant 0 : index
    %c0_93 = arith.constant 0 : index
    %133 = vector.load %arg7[%c0_92, %c0_93] : memref<128x128xf32, #tpu.memory_space<vmem>>, vector<128x128xf32>
    %cst_94 = arith.constant dense<0.000000e+00> : vector<8x128xf32>
    %134 = tpu.matmul %130, %133, %cst_94 {dimension_numbers = #tpu.dot_dimension_numbers<[1], [0], [0], [1], [0, 0, 1, 1], [], []>} : vector<8x128xf32>, vector<128x128xf32>, vector<8x128xf32> -> vector<8x128xf32>
    %135 = arith.addf %132, %134 : vector<8x128xf32>
    %c0_95 = arith.constant 0 : index
    %c0_96 = arith.constant 0 : index
    %136 = vector.load %arg8[%c0_95, %c0_96] : memref<8x128xf32, #tpu.memory_space<vmem>>, vector<8x128xf32>
    tpu.vector_store %arg8[%c0_95, %c0_96], %135 {strides = array<i32>} : memref<8x128xf32, #tpu.memory_space<vmem>>, vector<8x128xf32>,
    return
  }
  func.func @transform_1(%arg0: i32, %arg1: memref<5xi32, #tpu.memory_space<smem>>, %arg2: memref<4xi32, #tpu.memory_space<smem>>, %arg3: memref<4xi32, #tpu.memory_space<smem>>, %arg4: memref<4xi32, #tpu.memory_space<smem>>) -> (i32, i32) {
    %c0_i32 = arith.constant 0 : i32
    %c0_i32_0 = arith.constant 0 : i32
    %c0_i32_1 = arith.constant 0 : i32
    return %c0_i32, %c0_i32_0 : i32, i32
  }
  func.func @transform_2(%arg0: i32, %arg1: memref<5xi32, #tpu.memory_space<smem>>, %arg2: memref<4xi32, #tpu.memory_space<smem>>, %arg3: memref<4xi32, #tpu.memory_space<smem>>, %arg4: memref<4xi32, #tpu.memory_space<smem>>) -> (i32, i32) {
    %c0_i32 = arith.constant 0 : i32
    %c0_i32_0 = arith.constant 0 : i32
    %c0_i32_1 = arith.constant 0 : i32
    return %c0_i32, %c0_i32_0 : i32, i32
  }
  func.func @transform_3(%arg0: i32, %arg1: memref<5xi32, #tpu.memory_space<smem>>, %arg2: memref<4xi32, #tpu.memory_space<smem>>, %arg3: memref<4xi32, #tpu.memory_space<smem>>, %arg4: memref<4xi32, #tpu.memory_space<smem>>) -> (i32, i32) {
    %c0_i32 = arith.constant 0 : i32
    %c0_i32_0 = arith.constant 0 : i32
    %c0_i32_1 = arith.constant 0 : i32
    return %c0_i32, %c0_i32_0 : i32, i32
  }
}

</mosaic_0001>

<bundles_post_ra>
// kernel: tpu_custom_call.1
= control target key start
LH: loop header
LB: loop body
LE: loop exit
PB: predicated region body
PF: predicated region fallthrough
CT: control target
= control target key end

     0   :  { %s854_s30 = smov [#allocation5]   ;;  %s855_s8 = smov [#allocation6]   ;;  %s1191_s0 = inlined_call_operand.hbm [shape: s32[5], index: 0, kind: input, shape index: {}]   ;;  %s1192_s4 = inlined_call_operand.hbm [shape: f32[12,8,128], index: 4, kind: input, shape index: {}]   ;;  %s1193_s5 = inlined_call_operand.hbm [shape: f32[128,128], index: 5, kind: input, shape index: {}]   ;;  %s1194_s6 = inlined_call_operand.hbm [shape: f32[128,128], index: 6, kind: input, shape index: {}]   ;;  %s1195_s7 = inlined_call_operand.hbm [shape: f32[8,128], index: 7, kind: output, shape index: {}]   ;;  %s1196_s1 = inlined_call_operand.hbm [shape: s32[4], index: 1, kind: input, shape index: {}]   ;;  %s1197_s2 = inlined_call_operand.vmem [shape: s32[4], index: 2, kind: input, shape index: {}]   ;;  %s1198_s3 = inlined_call_operand.vmem [shape: s32[4], index: 3, kind: input, shape index: {}]  }
   0x1   :  { %s13_s26 = sshll.u32 %s1191_s0, 4  ;;  %s18_s29 = sshll.u32 %s1196_s1, 4  ;;  %s14_s26 = int_to_ptr.hbm [resolvable:$true] %s13_s26  ;;  %s19_s29 = int_to_ptr.hbm [resolvable:$true] %s18_s29 }
   0x2   :  { %16 = dma.hbm_to_smem %s14_s26, 16, %s854_s30, [#allocation4] }
   0x3   :  { %21 = dma.hbm_to_smem %s19_s29, 16, %s855_s8, [#allocation4] }
   0x4   :  { %s23_s11 = sshll.u32 %s1197_s2, 4  ;;  %s28_s14 = sshll.u32 %s1198_s3, 4  ;;  %s24_s11 = int_to_ptr.vmem [resolvable:$true] %s23_s11  ;;  %s29_s14 = int_to_ptr.vmem [resolvable:$true] %s28_s14 }
   0x5   :  { %s856_s0 = smov [#allocation7]   ;;  %s857_s15 = smov [#allocation8]  }
   0x6   :  { %26 = dma.vmem_to_smem %s24_s11, 16, %s856_s0, [#allocation4] }
   0x7   :  { %31 = dma.vmem_to_smem %s29_s14, 16, %s857_s15, [#allocation4] }
   0x8   :  { %844 = dma.done.wait [#allocation4], 64 }
   0x9   :  { %845 = vsyncadd [#allocation4], 4294967232 }
   0xa   :  { %34 = sfence }
   0xb   :  { %35 = vsyncpa [#allocation10], 0 }
   0xc   :  { %36 = vsyncpa [#allocation13], 0 }
   0xd   :  { %37 = vsyncpa [#allocation11], 0  ;;  %s42_s2 = sshll.u32 %s1193_s5, 4  ;;  %s858_s17 = smov [#allocation9]   ;;  %s43_s2 = int_to_ptr.hbm [resolvable:$true] %s42_s2 }
   0xe   :  { %s44_s18 = sshll.u32 %s858_s17, 4  ;;  %s55_s20 = sshll.u32 %s1194_s6, 4  ;;  %s45_s18 = int_to_ptr.vmem [resolvable:$true] %s44_s18  ;;  %s56_s20 = int_to_ptr.hbm [resolvable:$true] %s55_s20 }
   0xf   :  { %s859_s21 = smov 128   ;;  %s860_s22 = smov 8  }
  0x10   :  { %50 = dma.hbm_to_vmem [thread:$0]  %s43_s2, 2048, %s45_s18, [#allocation10], %s859_s21, %s859_s21, %s860_s22  }
  0x11   :  { %s861_s23 = smov [#allocation12]  }
  0x12   :  { %s57_s24 = sshll.u32 %s861_s23, 4  ;;  %s58_s24 = int_to_ptr.vmem [resolvable:$true] %s57_s24 }
  0x13   :  { %63 = dma.hbm_to_vmem [thread:$0]  %s56_s20, 2048, %s58_s24, [#allocation13], %s859_s21, %s859_s21, %s860_s22  }
  0x14   :  { %846 = dma.done.wait [#allocation10], 2048  }
  0x15   :  { %847 = vsyncadd [#allocation10], 4294965248 }
  0x16   :  { %848 = dma.done.wait [#allocation13], 2048  }
  0x17   :  { %849 = vsyncadd [#allocation13], 4294965248  ;;  %s72_s5 = sld [smem:[#allocation5]]  ;;  %s862_s25 = smov [#allocation2]  }
  0x18   :  { %s926_s26 = sshll.u32 %s862_s25, 4  ;;  %s562_s27 = sld [smem:[#allocation5 + $0x1]]  ;;  %s85_s26 = int_to_ptr.vmem [resolvable:$true] %s926_s26 }
  0x19   :  { %s863_s6 = smov [#allocation2 + $0x8]   ;;  %s931_s29 = sld [smem:[#allocation5 + $0x2]] }
  0x1a   :  { %s929_s28 = sshll.u32 %s863_s6, 4  ;;  %s864_s30 = smov [#allocation2 + $0x10]   ;;  %s102_s28 = int_to_ptr.vmem [resolvable:$true] %s929_s28 }
  0x1b   :  { %s934_s8 = sshll.u32 %s864_s30, 4  ;;  %s936_s9 = sld [smem:[#allocation5 + $0x3]]  ;;  %s119_s8 = int_to_ptr.vmem [resolvable:$true] %s934_s8 }
  0x1c   :  { %s865_s11 = smov [#allocation2 + $0x18]   ;;  %s950_s22 = scalar_lea.hbm %s1192_s4, 96 }
  0x1d   :  { %s561_s10 = sshll.u32 %s72_s5, 3  ;;  %s939_s12 = sshll.u32 %s865_s11, 4  ;;  %s136_s12 = int_to_ptr.vmem [resolvable:$true] %s939_s12 }
  0x1e   :  { %s74_s0 = scalar_lea.hbm %s1192_s4, %s561_s10  ;;  %s563_s15 = sshll.u32 %s562_s27, 3 }
  0x1f   :  { %s82_s1 = sshll.u32 %s74_s0, 4  ;;  %s90_s17 = scalar_lea.hbm %s1192_s4, %s563_s15  ;;  %s83_s1 = int_to_ptr.hbm [resolvable:$true] %s82_s1 }
  0x20   :  { %s99_s18 = sshll.u32 %s90_s17, 4  ;;  %s700_s3 = sshra.s32 %s83_s1, 4  ;;  %s701_s3 = int_to_ptr.hbm [resolvable:$true] %s700_s3  ;;  %s100_s18 = int_to_ptr.hbm [resolvable:$true] %s99_s18 }
  0x21   :  { %s702_s19 = scalar_lea.hbm %s701_s3, 8  ;;  %p705_p1 = scmp.lt.s32.totalorder %s701_s3, %s1192_s4 }
  0x22   :  { %p703_p0 = scmp.ne.s32.totalorder %s701_s3, %s702_s19  ;;  %p706_p2 = scmp.lt.s32.totalorder %s950_s22, %s702_s19 }
  0x24   :  { %p707_p3 = por %p706_p2, %p705_p1 }
  0x26   :  { %p708_p4 = pnand %p707_p3, %p703_p0 }
  0x28   :  { %711 = shalt.err (!%p708_p4)  }
  0x29   :  { %87 = dma.hbm_to_vmem [thread:$0]  %s83_s1, 128, %s85_s26, [#allocation3] }
  0x2a   :  { %s565_s5 = sshll.u32 %s931_s29, 3  ;;  %s724_s25 = sshra.s32 %s100_s18, 4  ;;  %s725_s25 = int_to_ptr.hbm [resolvable:$true] %s724_s25 }
  0x2b   :  { %s726_s27 = scalar_lea.hbm %s725_s25, 8  ;;  %p729_p6 = scmp.lt.s32.totalorder %s725_s25, %s1192_s4 }
  0x2c   :  { %p727_p5 = scmp.ne.s32.totalorder %s725_s25, %s726_s27  ;;  %p730_p7 = scmp.lt.s32.totalorder %s950_s22, %s726_s27 }
  0x2e   :  { %p731_p8 = por %p730_p7, %p729_p6 }
  0x30   :  { %p732_p9 = pnand %p731_p8, %p727_p5 }
  0x32   :  { %735 = shalt.err (!%p732_p9)  }
  0x33   :  { %104 = dma.hbm_to_vmem [thread:$0]  %s100_s18, 128, %s102_s28, [#allocation3] }
  0x34   :  { %s107_s29 = scalar_lea.hbm %s1192_s4, %s565_s5  ;;  %s567_s11 = sshll.u32 %s936_s9, 3 }
  0x35   :  { %s116_s13 = sshll.u32 %s107_s29, 4  ;;  %s124_s15 = scalar_lea.hbm %s1192_s4, %s567_s11  ;;  %s117_s13 = int_to_ptr.hbm [resolvable:$true] %s116_s13 }
  0x36   :  { %s133_s1 = sshll.u32 %s124_s15, 4  ;;  %s748_s16 = sshra.s32 %s117_s13, 4  ;;  %s749_s16 = int_to_ptr.hbm [resolvable:$true] %s748_s16  ;;  %s134_s1 = int_to_ptr.hbm [resolvable:$true] %s133_s1 }
  0x37   :  { %s750_s2 = scalar_lea.hbm %s749_s16, 8  ;;  %p753_p11 = scmp.lt.s32.totalorder %s749_s16, %s1192_s4 }
  0x38   :  { %p751_p10 = scmp.ne.s32.totalorder %s749_s16, %s750_s2  ;;  %p754_p12 = scmp.lt.s32.totalorder %s950_s22, %s750_s2 }
  0x3a   :  { %p755_p13 = por %p754_p12, %p753_p11 }
  0x3c   :  { %p756_p0 = pnand %p755_p13, %p751_p10 }
  0x3e   :  { %759 = shalt.err (!%p756_p0)  }
  0x3f   :  { %121 = dma.hbm_to_vmem [thread:$0]  %s117_s13, 128, %s119_s8, [#allocation3] }
  0x40   :  { %s772_s28 = sshra.s32 %s134_s1, 4  ;;  %s773_s28 = int_to_ptr.hbm [resolvable:$true] %s772_s28 }
  0x41   :  { %s774_s9 = scalar_lea.hbm %s773_s28, 8  ;;  %p777_p2 = scmp.lt.s32.totalorder %s773_s28, %s1192_s4 }
  0x42   :  { %p775_p1 = scmp.ne.s32.totalorder %s773_s28, %s774_s9  ;;  %p778_p3 = scmp.lt.s32.totalorder %s950_s22, %s774_s9 }
  0x44   :  { %p779_p4 = por %p778_p3, %p777_p2 }
  0x46   :  { %p780_p5 = pnand %p779_p4, %p775_p1 }
  0x48   :  { %783 = shalt.err (!%p780_p5)  }
  0x49   :  { %138 = dma.hbm_to_vmem [thread:$0]  %s134_s1, 128, %s136_s12, [#allocation3] }
  0x4a   :  { %s568_s20 = sld [smem:[#allocation5 + $0x4]]  ;;  %s866_s21 = smov [#allocation2 + $0x20]  }
  0x4b   :  { %s152_s23 = sshll.u32 %s866_s21, 4  ;;  %s153_s23 = int_to_ptr.vmem [resolvable:$true] %s152_s23 }
  0x50   :  { %s569_s8 = sshll.u32 %s568_s20, 3 }
  0x51   :  { %s141_s25 = scalar_lea.hbm %s1192_s4, %s569_s8 }
  0x52   :  { %s150_s27 = sshll.u32 %s141_s25, 4  ;;  %s151_s27 = int_to_ptr.hbm [resolvable:$true] %s150_s27 }
  0x53   :  { %s796_s6 = sshra.s32 %s151_s27, 4  ;;  %s797_s6 = int_to_ptr.hbm [resolvable:$true] %s796_s6 }
  0x54   :  { %s798_s30 = scalar_lea.hbm %s797_s6, 8  ;;  %p801_p7 = scmp.lt.s32.totalorder %s797_s6, %s1192_s4 }
  0x55   :  { %p799_p6 = scmp.ne.s32.totalorder %s797_s6, %s798_s30  ;;  %p802_p8 = scmp.lt.s32.totalorder %s950_s22, %s798_s30 }
  0x57   :  { %p803_p9 = por %p802_p8, %p801_p7 }
  0x59   :  { %p804_p10 = pnand %p803_p9, %p799_p6 }
  0x5b   :  { %807 = shalt.err (!%p804_p10)  }
  0x5c   :  { %155 = dma.hbm_to_vmem [thread:$0]  %s151_s27, 128, %s153_s23, [#allocation3] }
  0x5d   :  { %850 = dma.done.wait [#allocation3], 640 }
  0x5e   :  { %851 = vsyncadd [#allocation3], 4294966656  ;;  %v990_v0 = vld [vmem:[#allocation12 + $0x78] sm:$0xff]  ;;  %v994_v2 = vld [vmem:[#allocation12 + $0x70] sm:$0xff]  ;;  %s1052_s4 = sld [smem:[#allocation7]] }
  0x5f   :  { %v992_v1 = vld [vmem:[#allocation9 + $0x78] sm:$0xff]  ;;  %212 = vmatpush.msra.mxu0 %v990_v0  ;;  %v998_v3 = vld [vmem:[#allocation9 + $0x70] sm:$0xff]  ;;  %v1000_v4 = vld [vmem:[#allocation12 + $0x68] sm:$0xff]  ;;  %296 = vmatpush.msra.mxu2 %v990_v0  ;;  %s1058_s12 = sld [smem:[#allocation6]] }
  0x60   :  { %232 = vmatpush.msra.mxu1 %v992_v1  ;;  %v1002_v5 = vld [vmem:[#allocation9 + $0x68] sm:$0xff]  ;;  %316 = vmatpush.msra.mxu3 %v992_v1  ;;  %v1008_v6 = vld [vmem:[#allocation12 + $0x60] sm:$0xff]  ;;  %v1016_v8 = vld [vmem:[#allocation12 + $0x58] sm:$0xff]  ;;  %s252_s14 = sld [smem:[#allocation8]] }
  0x61   :  { %213 = vmatpush.msra.mxu0 %v994_v2  ;;  %v1010_v7 = vld [vmem:[#allocation9 + $0x60] sm:$0xff]  ;;  %297 = vmatpush.msra.mxu2 %v994_v2  ;;  %v1018_v9 = vld [vmem:[#allocation9 + $0x58] sm:$0xff]  ;;  %v1024_v10 = vld [vmem:[#allocation12 + $0x50] sm:$0xff]  ;;  %s575_s0 = sld [smem:[#allocation7 + $0x1]] }
  0x62   :  { %233 = vmatpush.msra.mxu1 %v998_v3  ;;  %317 = vmatpush.msra.mxu3 %v998_v3  ;;  %v1026_v11 = vld [vmem:[#allocation9 + $0x50] sm:$0xff]  ;;  %v1032_v12 = vld [vmem:[#allocation12 + $0x48] sm:$0xff]  ;;  %v1040_v14 = vld [vmem:[#allocation12 + $0x40] sm:$0xff]  ;;  %s573_s15 = sld [smem:[#allocation6 + $0x1]] }
  0x63   :  { %214 = vmatpush.msra.mxu0 %v1000_v4  ;;  %298 = vmatpush.msra.mxu2 %v1000_v4  ;;  %v1034_v13 = vld [vmem:[#allocation9 + $0x48] sm:$0xff]  ;;  %v1042_v15 = vld [vmem:[#allocation9 + $0x40] sm:$0xff]  ;;  %v1048_v16 = vld [vmem:[#allocation12 + $0x38] sm:$0xff]  ;;  %s577_s9 = sld [smem:[#allocation8 + $0x1]] }
  0x64   :  { %234 = vmatpush.msra.mxu1 %v1002_v5  ;;  %318 = vmatpush.msra.mxu3 %v1002_v5  ;;  %v1050_v17 = vld [vmem:[#allocation9 + $0x38] sm:$0xff]  ;;  %v1060_v18 = vld [vmem:[#allocation12 + $0x30] sm:$0xff]  ;;  %v1068_v20 = vld [vmem:[#allocation12 + $0x28] sm:$0xff]  ;;  %s571_s22 = sshll.u32 %s1052_s4, 3  ;;  %s581_s18 = sld [smem:[#allocation7 + $0x2]] }
  0x65   :  { %215 = vmatpush.msra.mxu0 %v1008_v6  ;;  %299 = vmatpush.msra.mxu2 %v1008_v6  ;;  %v1062_v19 = vld [vmem:[#allocation9 + $0x30] sm:$0xff]  ;;  %v1070_v21 = vld [vmem:[#allocation9 + $0x28] sm:$0xff]  ;;  %v1076_v22 = vld [vmem:[#allocation12 + $0x20] sm:$0xff]  ;;  %s570_s29 = sshll.u32 %s1058_s12, 3  ;;  %s178_s11 = scalar_lea.vmem [#allocation2], %s571_s22 }
  0x66   :  { %235 = vmatpush.msra.mxu1 %v1010_v7  ;;  %319 = vmatpush.msra.mxu3 %v1010_v7  ;;  %v1078_v23 = vld [vmem:[#allocation9 + $0x20] sm:$0xff]  ;;  %v1084_v24 = vld [vmem:[#allocation12 + $0x18] sm:$0xff]  ;;  %v1094_v26 = vld [vmem:[#allocation12 + $0x10] sm:$0xff]  ;;  %s174_s13 = scalar_lea.vmem [#allocation2], %s570_s29  ;;  %s572_s1 = sshll.u32 %s252_s14, 3 }
  0x67   :  { %216 = vmatpush.msra.mxu0 %v1016_v8  ;;  %300 = vmatpush.msra.mxu2 %v1016_v8  ;;  %v1086_v25 = vld [vmem:[#allocation9 + $0x18] sm:$0xff]  ;;  %v1096_v27 = vld [vmem:[#allocation9 + $0x10] sm:$0xff]  ;;  %v1102_v28 = vld [vmem:[#allocation12 + $0x8] sm:$0xff]  ;;  %s254_s16 = scalar_lea.vmem [#allocation2], %s572_s1  ;;  %s576_s2 = sshll.u32 %s575_s0, 3 }
  0x68   :  { %236 = vmatpush.msra.mxu1 %v1018_v9  ;;  %320 = vmatpush.msra.mxu3 %v1018_v9  ;;  %v1104_v29 = vld [vmem:[#allocation9 + $0x8] sm:$0xff]  ;;  %v1110_v30 = vld [vmem:[#allocation12] sm:$0xff]  ;;  %v179_v32 = vld [vmem:[%s178_s11] sm:$0xff]  ;;  %s574_s17 = sshll.u32 %s573_s15, 3  ;;  %s262_s3 = scalar_lea.vmem [#allocation2], %s576_s2 }
  0x69   :  { %217 = vmatpush.msra.mxu0 %v1024_v10  ;;  %301 = vmatpush.msra.mxu2 %v1024_v10  ;;  %v1112_v31 = vld [vmem:[#allocation9] sm:$0xff]  ;;  %v175_v33 = vld [vmem:[%s174_s13] sm:$0xff]  ;;  %s258_s28 = scalar_lea.vmem [#allocation2], %s574_s17  ;;  %s579_s19 = sld [smem:[#allocation6 + $0x2]] }
  0x6a   :  { %237 = vmatpush.msra.mxu1 %v1026_v11  ;;  %321 = vmatpush.msra.mxu3 %v1026_v11  ;;  %s578_s20 = sshll.u32 %s577_s9, 3  ;;  %s582_s23 = sshll.u32 %s581_s18, 3 }
  0x6b   :  { %218 = vmatpush.msra.mxu0 %v1032_v12  ;;  %302 = vmatpush.msra.mxu2 %v1032_v12  ;;  %s338_s21 = scalar_lea.vmem [#allocation2], %s578_s20  ;;  %s346_s24 = scalar_lea.vmem [#allocation2], %s582_s23 }
  0x6c   :  { %238 = vmatpush.msra.mxu1 %v1034_v13  ;;  %322 = vmatpush.msra.mxu3 %v1034_v13  ;;  %s583_s25 = sld [smem:[#allocation8 + $0x2]]  ;;  %s867_s29 = smov [#allocation14]  }
  0x6d   :  { %219 = vmatpush.msra.mxu0 %v1040_v14  ;;  %303 = vmatpush.msra.mxu2 %v1040_v14  ;;  %s587_s27 = sld [smem:[#allocation7 + $0x3]]  ;;  %s510_s11 = sshll.u32 %s867_s29, 4  ;;  %s511_s11 = int_to_ptr.vmem [resolvable:$true] %s510_s11 }
  0x6e   :  { %239 = vmatpush.msra.mxu1 %v1042_v15  ;;  %323 = vmatpush.msra.mxu3 %v1042_v15  ;;  %s585_s6 = sld [smem:[#allocation6 + $0x3]]  ;;  %s512_s0 = sshll.u32 %s1195_s7, 4  ;;  %s513_s0 = int_to_ptr.hbm [resolvable:$true] %s512_s0 }
  0x6f   :  { %220 = vmatpush.msra.mxu0 %v1048_v16  ;;  %304 = vmatpush.msra.mxu2 %v1048_v16  ;;  %s580_s8 = sshll.u32 %s579_s19, 3 }
  0x70   :  { %240 = vmatpush.msra.mxu1 %v1050_v17  ;;  %324 = vmatpush.msra.mxu3 %v1050_v17  ;;  %s342_s5 = scalar_lea.vmem [#allocation2], %s580_s8 }
  0x71   :  { %221 = vmatpush.msra.mxu0 %v1060_v18  ;;  %305 = vmatpush.msra.mxu2 %v1060_v18 }
  0x72   :  { %241 = vmatpush.msra.mxu1 %v1062_v19  ;;  %325 = vmatpush.msra.mxu3 %v1062_v19  ;;  %s584_s30 = sshll.u32 %s583_s25, 3 }
  0x73   :  { %222 = vmatpush.msra.mxu0 %v1068_v20  ;;  %306 = vmatpush.msra.mxu2 %v1068_v20  ;;  %s422_s26 = scalar_lea.vmem [#allocation2], %s584_s30  ;;  %s588_s10 = sshll.u32 %s587_s27, 3 }
  0x74   :  { %242 = vmatpush.msra.mxu1 %v1070_v21  ;;  %326 = vmatpush.msra.mxu3 %v1070_v21  ;;  %s586_s4 = sshll.u32 %s585_s6, 3  ;;  %s430_s12 = scalar_lea.vmem [#allocation2], %s588_s10 }
  0x75   :  { %223 = vmatpush.msra.mxu0 %v1076_v22  ;;  %307 = vmatpush.msra.mxu2 %v1076_v22  ;;  %s426_s22 = scalar_lea.vmem [#allocation2], %s586_s4 }
  0x76   :  { %243 = vmatpush.msra.mxu1 %v1078_v23  ;;  %327 = vmatpush.msra.mxu3 %v1078_v23 }
  0x77   :  { %224 = vmatpush.msra.mxu0 %v1084_v24  ;;  %308 = vmatpush.msra.mxu2 %v1084_v24 }
  0x78   :  { %244 = vmatpush.msra.mxu1 %v1086_v25  ;;  %328 = vmatpush.msra.mxu3 %v1086_v25 }
  0x79   :  { %225 = vmatpush.msra.mxu0 %v1094_v26  ;;  %309 = vmatpush.msra.mxu2 %v1094_v26 }
  0x7a   :  { %245 = vmatpush.msra.mxu1 %v1096_v27  ;;  %329 = vmatpush.msra.mxu3 %v1096_v27 }
  0x7b   :  { %226 = vmatpush.msra.mxu0 %v1102_v28  ;;  %310 = vmatpush.msra.mxu2 %v1102_v28 }
  0x7c   :  { %246 = vmatpush.msra.mxu1 %v1104_v29  ;;  %330 = vmatpush.msra.mxu3 %v1104_v29 }
  0x7d   :  { %227 = vmatpush.msra.mxu0 %v1110_v30  ;;  %311 = vmatpush.msra.mxu2 %v1110_v30 }
  0x7e   :  { %247 = vmatpush.msra.mxu1 %v1112_v31  ;;  %228 = vmatmul.f32.vlgmr.msra.gmra.mxu0 %v179_v32 }
  0x7f   :  { %248 = vmatmul.f32.vlgmr.msra.gmra.mxu1 %v175_v33  ;;  %331 = vmatpush.msra.mxu3 %v1112_v31 }
  0x80   :  { %380 = vmatpush.msrb.mxu0 %v990_v0  ;;  %400 = vmatpush.msrb.mxu1 %v992_v1 }
  0x81   :  { %464 = vmatpush.msrb.mxu2 %v990_v0  ;;  %484 = vmatpush.msrb.mxu3 %v992_v1 }
  0x82   :  { %381 = vmatpush.msrb.mxu0 %v994_v2  ;;  %401 = vmatpush.msrb.mxu1 %v998_v3 }
  0x83   :  { %465 = vmatpush.msrb.mxu2 %v994_v2  ;;  %485 = vmatpush.msrb.mxu3 %v998_v3 }
  0x84   :  { %382 = vmatpush.msrb.mxu0 %v1000_v4  ;;  %402 = vmatpush.msrb.mxu1 %v1002_v5 }
  0x85   :  { %466 = vmatpush.msrb.mxu2 %v1000_v4  ;;  %486 = vmatpush.msrb.mxu3 %v1002_v5 }
  0x86   :  { %383 = vmatpush.msrb.mxu0 %v1008_v6  ;;  %403 = vmatpush.msrb.mxu1 %v1010_v7 }
  0x87   :  { %467 = vmatpush.msrb.mxu2 %v1008_v6  ;;  %487 = vmatpush.msrb.mxu3 %v1010_v7 }
  0x88   :  { %384 = vmatpush.msrb.mxu0 %v1016_v8  ;;  %404 = vmatpush.msrb.mxu1 %v1018_v9 }
  0x89   :  { %468 = vmatpush.msrb.mxu2 %v1016_v8  ;;  %488 = vmatpush.msrb.mxu3 %v1018_v9 }
  0x8a   :  { %385 = vmatpush.msrb.mxu0 %v1024_v10  ;;  %405 = vmatpush.msrb.mxu1 %v1026_v11 }
  0x8b   :  { %469 = vmatpush.msrb.mxu2 %v1024_v10  ;;  %489 = vmatpush.msrb.mxu3 %v1026_v11 }
  0x8c   :  { %386 = vmatpush.msrb.mxu0 %v1032_v12  ;;  %406 = vmatpush.msrb.mxu1 %v1034_v13 }
  0x8d   :  { %470 = vmatpush.msrb.mxu2 %v1032_v12  ;;  %490 = vmatpush.msrb.mxu3 %v1034_v13 }
  0x8e   :  { %387 = vmatpush.msrb.mxu0 %v1040_v14  ;;  %407 = vmatpush.msrb.mxu1 %v1042_v15 }
  0x8f   :  { %471 = vmatpush.msrb.mxu2 %v1040_v14  ;;  %491 = vmatpush.msrb.mxu3 %v1042_v15 }
  0x90   :  { %388 = vmatpush.msrb.mxu0 %v1048_v16  ;;  %408 = vmatpush.msrb.mxu1 %v1050_v17 }
  0x91   :  { %472 = vmatpush.msrb.mxu2 %v1048_v16  ;;  %492 = vmatpush.msrb.mxu3 %v1050_v17 }
  0x92   :  { %389 = vmatpush.msrb.mxu0 %v1060_v18  ;;  %409 = vmatpush.msrb.mxu1 %v1062_v19 }
  0x93   :  { %473 = vmatpush.msrb.mxu2 %v1060_v18  ;;  %493 = vmatpush.msrb.mxu3 %v1062_v19 }
  0x94   :  { %390 = vmatpush.msrb.mxu0 %v1068_v20  ;;  %410 = vmatpush.msrb.mxu1 %v1070_v21 }
  0x95   :  { %474 = vmatpush.msrb.mxu2 %v1068_v20  ;;  %494 = vmatpush.msrb.mxu3 %v1070_v21 }
  0x96   :  { %391 = vmatpush.msrb.mxu0 %v1076_v22  ;;  %411 = vmatpush.msrb.mxu1 %v1078_v23 }
  0x97   :  { %475 = vmatpush.msrb.mxu2 %v1076_v22  ;;  %495 = vmatpush.msrb.mxu3 %v1078_v23 }
  0x98   :  { %392 = vmatpush.msrb.mxu0 %v1084_v24  ;;  %412 = vmatpush.msrb.mxu1 %v1086_v25 }
  0x99   :  { %476 = vmatpush.msrb.mxu2 %v1084_v24  ;;  %496 = vmatpush.msrb.mxu3 %v1086_v25 }
  0x9a   :  { %393 = vmatpush.msrb.mxu0 %v1094_v26  ;;  %413 = vmatpush.msrb.mxu1 %v1096_v27 }
  0x9b   :  { %477 = vmatpush.msrb.mxu2 %v1094_v26  ;;  %497 = vmatpush.msrb.mxu3 %v1096_v27 }
  0x9c   :  { %394 = vmatpush.msrb.mxu0 %v1102_v28  ;;  %414 = vmatpush.msrb.mxu1 %v1104_v29 }
  0x9d   :  { %478 = vmatpush.msrb.mxu2 %v1102_v28  ;;  %498 = vmatpush.msrb.mxu3 %v1104_v29 }
  0x9e   :  { %395 = vmatpush.msrb.mxu0 %v1110_v30  ;;  %415 = vmatpush.msrb.mxu1 %v1112_v31 }
  0x9f   :  { %479 = vmatpush.msrb.mxu2 %v1110_v30  ;;  %499 = vmatpush.msrb.mxu3 %v1112_v31 }
  0xfb   :  { %v229_v34 = vpop.f32.mrf.mxu0 }
  0xfc   :  { %v249_v35 = vpop.f32.mrf.mxu1 }
  0xfd   :  { %v250_v36 = vadd.f32 %v249_v35, %v229_v34 }
  0xff   :  { %255 = vst [vmem:[%s254_s16] sm:$0xff] %v250_v36 }
 0x106   :  { %v263_v37 = vld [vmem:[%s262_s3] sm:$0xff] }
 0x107   :  { %v259_v38 = vld [vmem:[%s258_s28] sm:$0xff]  ;;  %312 = vmatmul.f32.vlgmr.msra.gmra.mxu2 %v263_v37 }
 0x108   :  { %332 = vmatmul.f32.vlgmr.msra.gmra.mxu3 %v259_v38 }
 0x18a   :  { %v313_v39 = vpop.f32.mrf.mxu2 }
 0x18b   :  { %v333_v40 = vpop.f32.mrf.mxu3 }
 0x18c   :  { %v334_v41 = vadd.f32 %v333_v40, %v313_v39 }
 0x18e   :  { %339 = vst [vmem:[%s338_s21] sm:$0xff] %v334_v41 }
 0x195   :  { %v347_v42 = vld [vmem:[%s346_s24] sm:$0xff] }
 0x196   :  { %v343_v43 = vld [vmem:[%s342_s5] sm:$0xff]  ;;  %396 = vmatmul.f32.vlgmr.msrb.gmra.mxu0 %v347_v42 }
 0x197   :  { %416 = vmatmul.f32.vlgmr.msrb.gmra.mxu1 %v343_v43 }
 0x213   :  { %v397_v44 = vpop.f32.mrf.mxu0 }
 0x214   :  { %v417_v45 = vpop.f32.mrf.mxu1 }
 0x215   :  { %v418_v46 = vadd.f32 %v417_v45, %v397_v44 }
 0x217   :  { %423 = vst [vmem:[%s422_s26] sm:$0xff] %v418_v46 }
 0x21e   :  { %v431_v47 = vld [vmem:[%s430_s12] sm:$0xff] }
 0x21f   :  { %v427_v48 = vld [vmem:[%s426_s22] sm:$0xff]  ;;  %480 = vmatmul.f32.vlgmr.msrb.gmra.mxu2 %v431_v47 }
 0x220   :  { %500 = vmatmul.f32.vlgmr.msrb.gmra.mxu3 %v427_v48 }
 0x2a2   :  { %v481_v49 = vpop.f32.mrf.mxu2 }
 0x2a3   :  { %v501_v50 = vpop.f32.mrf.mxu3 }
 0x2a4   :  { %v502_v51 = vadd.f32 %v501_v50, %v481_v49 }
 0x2a6   :  { %504 = vst [vmem:[#allocation14] sm:$0xff] %v502_v51 }
 0x2a7   :  { %515 = dma.vmem_to_hbm [thread:$0]  %s511_s11, 128, %s513_s0, [#allocation11]  }
 0x2a8   :  { %852 = dma.done.wait [#allocation11], 128  }
 0x2a9   :  { %853 = vsyncadd [#allocation11], 4294967168 }
 0x2aa   :  { %520 = vsyncpa [#allocation10], 1 }
 0x2ab   :  { %521 = vsyncpa [#allocation13], 1 }
 0x2ac   :  { %522 = vsyncpa [#allocation11], 1 }
 0x2ad   :  { %523 = vsyncmov [#allocation3] }
 0x2b0   :  { %s524_s15 = vpop.sfrf %523 }
 0x2b1   :  { %p589_p11 = scmp.ne.s32.totalorder %s524_s15, 0 }
 0x2b3   :  { %528 = shalt.err (%p589_p11)  }

</bundles_post_ra>
